<compile_context>
chip_gen: v7x
topology: tpu7x:2x2x1
jax: 0.10.0
libtpu: 0.0.40
codegen_flags: <defaults>
</compile_context>

<pallas_src>
import math

import jax
import jax.numpy as jnp
from jax.experimental import pallas as pl
from jax.experimental.pallas import tpu as pltpu


# ---------------------------------------------------------------------------
# Fused kernel: (tile_m, K) @ (K, E) + bias + positions  ->  (tile_m, E)
# ---------------------------------------------------------------------------
def _patch_embed_kernel(x_ref, w_ref, b_ref, pos_ref, o_ref):
    # x_ref:  (1, tile_m, K) bf16     w_ref: (K, E) bf16
    # b_ref:  (1, E) f32              pos_ref: (tile_m, E) f32
    # o_ref:  (1, tile_m, E) f32
    acc = jnp.dot(x_ref[0], w_ref[...], preferred_element_type=jnp.float32)
    acc = acc + b_ref[...] + pos_ref[...]
    o_ref[0] = acc.astype(o_ref.dtype)


def _choose_tile_m(m, cap=512):
    if m <= cap:
        return m
    # prefer an exact divisor that is a multiple of 8
    for t in range(cap, 7, -8):
        if m % t == 0:
            return t
    return cap  # ragged last tile: Pallas masks out-of-bounds rows


# ---------------------------------------------------------------------------
# PatchEmbedding.forward
# ---------------------------------------------------------------------------
def patch_embedding_forward(x, w, b, positions, patch_size):
    """x: (B, C, H, W) f32; w: (E, C, p, p) (PyTorch Conv2d layout); b: (E,);
    positions: (num_patches, E).  Returns (B, num_patches, E) f32."""
    B, C, H, W = x.shape
    p = patch_size
    assert H % p == 0 and W % p == 0, (H, W, p)
    hp, wp = H // p, W // p
    num_patches = hp * wp
    E = w.shape[0]
    K = C * p * p

    # space-to-depth (pure permutation): (B,C,H,W) -> (B, hp*wp, C*p*p),
    # tap order (c, dy, dx) to match PyTorch's conv weight flattening.
    xb = x.astype(jnp.bfloat16).reshape(B, C, hp, p, wp, p)
    patches = xb.transpose(0, 2, 4, 1, 3, 5).reshape(B, num_patches, K)

    # weight: (E, C, p, p) -> (C*p*p, E), same (c, dy, dx) order.
    w_mat = w.transpose(1, 2, 3, 0).reshape(K, E).astype(jnp.bfloat16)
    b2 = b.reshape(1, E).astype(jnp.float32)
    pos = positions.astype(jnp.float32)

    tile_m = _choose_tile_m(num_patches)
    grid = (B, pl.cdiv(num_patches, tile_m))

    cost = pl.CostEstimate(
        flops=2 * B * num_patches * K * E,
        transcendentals=0,
        bytes_accessed=(patches.size * 2 + w_mat.size * 2
                        + b2.size * 4 + pos.size * 4
                        + B * num_patches * E * 4),
    )

    return pl.pallas_call(
        _patch_embed_kernel,
        grid=grid,
        in_specs=[
            pl.BlockSpec((1, tile_m, K), lambda bi, mi: (bi, mi, 0)),
            pl.BlockSpec((K, E), lambda bi, mi: (0, 0)),
            pl.BlockSpec((1, E), lambda bi, mi: (0, 0)),
            pl.BlockSpec((tile_m, E), lambda bi, mi: (mi, 0)),
        ],
        out_specs=pl.BlockSpec((1, tile_m, E), lambda bi, mi: (bi, mi, 0)),
        out_shape=jax.ShapeDtypeStruct((B, num_patches, E), jnp.float32),
        compiler_params=pltpu.CompilerParams(
            dimension_semantics=("parallel", "parallel")),
        cost_estimate=cost,
    )(patches, w_mat, b2, pos)


# ---------------------------------------------------------------------------
# Plain-JAX reference (f32) for a numerical sanity check
# ---------------------------------------------------------------------------
def _reference(x, w, b, positions, patch_size):
    B, C, H, W = x.shape
    p = patch_size
    hp, wp = H // p, W // p
    K = C * p * p
    E = w.shape[0]
    patches = x.reshape(B, C, hp, p, wp, p).transpose(0, 2, 4, 1, 3, 5)
    patches = patches.reshape(B, hp * wp, K)
    w_mat = w.transpose(1, 2, 3, 0).reshape(K, E)
    return patches @ w_mat + b[None, None, :] + positions[None, :, :]


# ---------------------------------------------------------------------------
if __name__ == "__main__":
    batch = 2
    in_channels = 4
    img_size = 16
    patch_size = 4
    emb_size = 32                      # note: real ViT emb (e.g. 768) is lane-dense
    num_patches = (img_size // patch_size) ** 2

    key = jax.random.PRNGKey(0)
    kx, kw, kb, kp = jax.random.split(key, 4)
    x = jax.random.normal(kx, (batch, in_channels, img_size, img_size), jnp.float32)
    # PyTorch Conv2d weight layout: (out_channels=emb, in_channels, p, p)
    w = jax.random.normal(
        kw, (emb_size, in_channels, patch_size, patch_size), jnp.float32
    ) / math.sqrt(in_channels * patch_size ** 2)
    b = jax.random.normal(kb, (emb_size,), jnp.float32) * 0.01
    positions = jax.random.normal(kp, (num_patches, emb_size), jnp.float32)

    out = patch_embedding_forward(x, w, b, positions, patch_size)
    out = jax.block_until_ready(out)

    assert out.shape == (batch, num_patches, emb_size), out.shape
    assert out.dtype == jnp.float32

    ref = _reference(x, w, b, positions, patch_size)
    # bf16 MXU inputs with f32 accumulation -> relaxed tolerance vs f32 reference
    assert bool(jnp.allclose(out, ref, atol=5e-2, rtol=5e-2)), \
        float(jnp.max(jnp.abs(out - ref)))

    print("KERNEL_OK")
</pallas_src>

<mosaic_0001>
module attributes {stable_mosaic.version = 11 : i64} {
  func.func @_patch_embed_kernel(%arg0: i32, %arg1: i32, %arg2: memref<1x16x64xbf16, #tpu.memory_space<vmem>>, %arg3: memref<64x32xbf16, #tpu.memory_space<vmem>>, %arg4: memref<1x32xf32, #tpu.memory_space<vmem>>, %arg5: memref<16x32xf32, #tpu.memory_space<vmem>>, %arg6: memref<1x16x32xf32, #tpu.memory_space<vmem>>) attributes {dimension_semantics = [#tpu.dimension_semantics<parallel>, #tpu.dimension_semantics<parallel>], iteration_bounds = array<i64: 2, 1>, scalar_prefetch = 0 : i64, scratch_operands = 0 : i64, tpu.core_type = #tpu.core_type<tc>, window_params = [{transform_indices = @transform_0, window_bounds = array<i64: 1, 16, 64>}, {pipeline_mode = #tpu.pipeline_mode<synchronous>, transform_indices = @transform_1, window_bounds = array<i64: 64, 32>}, {pipeline_mode = #tpu.pipeline_mode<synchronous>, transform_indices = @transform_2, window_bounds = array<i64: 1, 32>}, {transform_indices = @transform_3, window_bounds = array<i64: 16, 32>}, {transform_indices = @transform_4, window_bounds = array<i64: 1, 16, 32>}]} {
    %c0 = arith.constant 0 : index
    %c0_0 = arith.constant 0 : index
    %c0_1 = arith.constant 0 : index
    %0 = vector.load %arg2[%c0, %c0_0, %c0_1] : memref<1x16x64xbf16, #tpu.memory_space<vmem>>, vector<1x16x64xbf16>
    %1 = vector.shape_cast %0 : vector<1x16x64xbf16> to vector<16x64xbf16>
    %c0_2 = arith.constant 0 : index
    %c0_3 = arith.constant 0 : index
    %2 = vector.load %arg3[%c0_2, %c0_3] : memref<64x32xbf16, #tpu.memory_space<vmem>>, vector<64x32xbf16>
    %cst = arith.constant dense<0.000000e+00> : vector<16x32xf32>
    %3 = tpu.matmul %1, %2, %cst {dimension_numbers = #tpu.dot_dimension_numbers<[1], [0], [0], [1], [0, 0, 1, 1], [], []>} : vector<16x64xbf16>, vector<64x32xbf16>, vector<16x32xf32> -> vector<16x32xf32>
    %c0_4 = arith.constant 0 : index
    %c0_5 = arith.constant 0 : index
    %4 = vector.load %arg4[%c0_4, %c0_5] : memref<1x32xf32, #tpu.memory_space<vmem>>, vector<1x32xf32>
    %5 = vector.broadcast %4 : vector<1x32xf32> to vector<16x32xf32>
    %6 = arith.addf %3, %5 : vector<16x32xf32>
    %c0_6 = arith.constant 0 : index
    %c0_7 = arith.constant 0 : index
    %7 = vector.load %arg5[%c0_6, %c0_7] : memref<16x32xf32, #tpu.memory_space<vmem>>, vector<16x32xf32>
    %8 = arith.addf %6, %7 : vector<16x32xf32>
    %c0_8 = arith.constant 0 : index
    %c0_9 = arith.constant 0 : index
    %c0_10 = arith.constant 0 : index
    %9 = vector.load %arg6[%c0_8, %c0_9, %c0_10] : memref<1x16x32xf32, #tpu.memory_space<vmem>>, vector<1x16x32xf32>
    %10 = vector.shape_cast %9 : vector<1x16x32xf32> to vector<16x32xf32>
    %11 = vector.shape_cast %8 : vector<16x32xf32> to vector<1x16x32xf32>
    tpu.vector_store %arg6[%c0_8, %c0_9, %c0_10], %11 {strides = array<i32>} : memref<1x16x32xf32, #tpu.memory_space<vmem>>, vector<1x16x32xf32>,
    return
  }
  func.func @transform_0(%arg0: i32, %arg1: i32) -> (i32, i32, i32) {
    %c0_i32 = arith.constant 0 : i32
    %c0_i32_0 = arith.constant 0 : i32
    return %arg0, %arg1, %c0_i32 : i32, i32, i32
  }
  func.func @transform_1(%arg0: i32, %arg1: i32) -> (i32, i32) {
    %c0_i32 = arith.constant 0 : i32
    %c0_i32_0 = arith.constant 0 : i32
    %c0_i32_1 = arith.constant 0 : i32
    return %c0_i32, %c0_i32_0 : i32, i32
  }
  func.func @transform_2(%arg0: i32, %arg1: i32) -> (i32, i32) {
    %c0_i32 = arith.constant 0 : i32
    %c0_i32_0 = arith.constant 0 : i32
    %c0_i32_1 = arith.constant 0 : i32
    return %c0_i32, %c0_i32_0 : i32, i32
  }
  func.func @transform_3(%arg0: i32, %arg1: i32) -> (i32, i32) {
    %c0_i32 = arith.constant 0 : i32
    %c0_i32_0 = arith.constant 0 : i32
    return %arg1, %c0_i32 : i32, i32
  }
  func.func @transform_4(%arg0: i32, %arg1: i32) -> (i32, i32, i32) {
    %c0_i32 = arith.constant 0 : i32
    %c0_i32_0 = arith.constant 0 : i32
    return %arg0, %arg1, %c0_i32 : i32, i32, i32
  }
}

</mosaic_0001>

<bundles_post_ra>
// kernel: tpu_custom_call.1
= control target key start
LH: loop header
LB: loop body
LE: loop exit
PB: predicated region body
PF: predicated region fallthrough
CT: control target
= control target key end

     0   :  { %9 = vsyncpa [#allocation3], 0  ;;  %s808_s0 = inlined_call_operand.vmem [shape: bf16[2,16,64], index: 0, kind: input, shape index: {}]   ;;  %s809_s1 = inlined_call_operand.vmem [shape: bf16[64,32], index: 1, kind: input, shape index: {}]   ;;  %s810_s2 = inlined_call_operand.vmem [shape: f32[1,32], index: 2, kind: input, shape index: {}]   ;;  %s811_s3 = inlined_call_operand.vmem [shape: f32[16,32], index: 3, kind: input, shape index: {}]   ;;  %s812_s4 = inlined_call_operand.hbm [shape: f32[2,16,32], index: 4, kind: output, shape index: {}]  }
   0x1   :  { %11 = vsyncpa [#allocation3 + $0x1], 0  ;;  %s672_s15 = smov 0   ;;  %s674_s16 = smov 0  }
   0x2   :  { %s676_s17 = smov 0   ;;  %s678_s18 = smov 0  }
   0x3   :  { %s680_s19 = smov 0   ;;  %s682_s20 = smov 0  }
   0x4 LB: > { %s458_s21 = sadd.s32 4294967295, %s640_s20   ;;  %s459_s22 = sadd.s32 4294967294, %s640_s20   ;;  %s640_s20 = sphi %s682_s20, %s17_s20   ;;  %s636_s19 = sphi %s680_s19, %s819_s19   ;;  %s632_s18 = sphi %s678_s18, %s818_s18   ;;  %s628_s17 = sphi %s676_s17, %s817_s17   ;;  %s624_s16 = sphi %s674_s16, %s816_s16   ;;  %s620_s15 = sphi %s672_s15, %s815_s15  }
   0x5   : > { %s29_s23 = sadd.s32 1, %s636_s19  ;;  %s134_s24 = sadd.s32 1, %s628_s17 }
   0x6   : > { %p31_p0 = scmp.ge.s32.totalorder %s29_s23, 2  ;;  %p144_p1 = scmp.ne.s32.totalorder %s628_s17, %s624_s16 }
   0x7   : > { %p145_p2 = scmp.eq.s32.totalorder %s458_s21, 1  ;;  %p150_p3 = scmp.ne.s32.totalorder %s624_s16, %s620_s15 }
   0x8   : > { %s821_s23 = smov (%p31_p0, %s29_s23), 0  ;;  %p151_p5 = scmp.eq.s32.totalorder %s459_s22, 1 }
   0x9   : > { %p712_p4 = por %p145_p2, %p144_p1  ;;  %s129_s26 = ssub.s32 %s636_s19, %s821_s23 }
   0xa   : > { %p463_p6 = scmp.ge.s32.totalorder %s640_s20, 1  ;;  %p132_p7 = scmp.eq.s32.totalorder %s129_s26, 0 }
   0xb   : > { %p719_p8 = por %p151_p5, %p150_p3  ;;  %p197_p9 = scmp.lt.s32.totalorder %s640_s20, 3 }
   0xc   : > { %s725_s28 = scalar_select %p132_p7, %s628_s17, %s134_s24  }
   0xd   : > { %p198_p10 = pnand %p463_p6, %p197_p9 }
   0xe   : > { %v557_v0 = vld [vmem:[%s809_s1] sm:$0xff] (!%p198_p10)   ;;  %v642_v1 = vmov (!%p198_p10), 0.0   ;;  %v558_v2 = vld [vmem:[%s809_s1 + $0x8] sm:$0xff] (!%p198_p10)   ;;  %vm643_vm0 = vmmov (!%p198_p10), 0   ;;  %p233_p11 = scmp.lt.s32.totalorder (!%p198_p10), %s632_s18, 1  ;;  %v559_v3 = vld [vmem:[%s809_s1 + $0x10] sm:$0xff] (!%p198_p10)  }
   0xf   : > { %201 = sbr.rel (%p198_p10) target bundleno = 264 (0x108), region = 36  ;;  %486 = vmatprep.subr.bf16.mxu0 (!%p198_p10), %v642_v1  ;;  %494 = vmatprep.mubr.msk.bf16.mxu0 (!%p198_p10), %vm643_vm0, %v642_v1  ;;  %v560_v4 = vld [vmem:[%s809_s1 + $0x18] sm:$0xff] (!%p198_p10)   ;;  %vm296_vm1 = vcmask (!%p198_p10), 523264   ;;  %s229_s22 = sand.u32 (!%p198_p10), 1, %s624_s16   ;;  %v467_v6 = vld [vmem:[%s810_s2] ss:$0 sm:$0xff] (!%p198_p10) }
  0x10   : > { %487 = vmatpush3.bf16.msra.mxu0 (!%p198_p10), %v557_v0  ;;  %s464_s24 = sshll.u32 (!%p198_p10), %s229_s22, 4  ;;  %v341_v8 = vld [vmem:[%s811_s3] sm:$0xff] (!%p198_p10)  ;;  %s480_s8 = sshll.u32 (!%p198_p10), %s632_s18, 8  ;;  %vm345_vm2 = vcmask (!%p198_p10), 261120   ;;  %v342_v12 = vld [vmem:[%s811_s3 + $0x8] sm:$0xff] (!%p198_p10) }
  0x11   : > { %488 = vmatprep.subr.bf16.mxu0 (!%p198_p10), %v642_v1  ;;  %s231_s6 = scalar_lea.vmem (!%p198_p10), [#allocation2], %s464_s24  ;;  %s644_s21 = smov (!%p198_p10), [#allocation2]  }
  0x12   : > { %s566_s24 = sshll.u32 (!%p198_p10), %s644_s21, 4  ;;  %s567_s24 = int_to_ptr.vmem [resolvable:$false] %s566_s24 }
  0x13   : > { %s568_s26 = scalar_lea.vmem (!%p198_p10), %s567_s24, 512 }
  0x14   : > { %489 = vmatpush3.bf16.msra.mxu0 (!%p198_p10), %v558_v2 }
  0x15   : > { %490 = vmatprep.subr.bf16.mxu0 (!%p198_p10), %v642_v1 }
  0x16   : > { %s234_s7 = scalar_select %p233_p11, %s632_s18, 1 }
  0x17   : > { %s762_s18 = scalar_lea.sflag [#allocation3], %s229_s22 }
  0x18   : > { %s479_s10 = sshll.u32 %s234_s7, 3  ;;  %491 = vmatpush3.bf16.msra.mxu0 %v559_v3  ;;  %s364_s7 = sshll.u32 %s231_s6, 4  ;;  %s760_s7 = int_to_ptr.vmem [resolvable:$true] %s364_s7 }
  0x19   : > { %s240_s13 = scalar_lea.vmem %s808_s0, %s479_s10  ;;  %492 = vmatprep.subr.bf16.mxu0 %v642_v1  ;;  %s562_s14 = scalar_lea.vmem %s760_s7, 256 }
  0x1a   : > { %v561_v5 = vld [vmem:[%s240_s13] sm:$0xff]   ;;  %s758_s13 = scalar_lea.hbm %s812_s4, %s480_s8  ;;  %p563_p12 = scmp.ne.s32.totalorder %s760_s7, %s562_s14 }
  0x1b   : > { %p569_p1 = scmp.lt.s32.totalorder %s760_s7, %s567_s24  ;;  %p570_p2 = scmp.lt.s32.totalorder %s568_s26, %s562_s14 }
  0x1c   : > { %493 = vmatpush3.bf16.msra.mxu0 %v560_v4  ;;  %p564_p13 = pnand %p563_p12, %p712_p4 }
  0x1d   : > { %p571_p3 = por %p570_p2, %p569_p1 }
  0x1e   : > { %p565_p0 = pneg %p564_p13 }
  0x1f   : > { %495 = vmatmul.mubr.msk.bf16.vlgmr.msra.gmra.mrb[0].mxu0 %vm296_vm1, %v561_v5 }
  0x20   : > { %p572_p5 = pnand %p571_p3, %p565_p0 }
  0xf2   : > { %v334_v7 = vpop.f32.mrb[0].mxu0 }
  0xf3   : > { %v335_v9 = vadd.f32 %v467_v6, %v334_v7  ;;  %v496_v10 = vpop.f32.mrb[1].mxu0 }
  0xf4   : > { %v337_v11 = vpop.f32.mrb[2].mxu0 }
  0xf5   : > { %v343_v13 = vadd.f32 %v341_v8, %v335_v9  ;;  %v338_v14 = vadd.f32 %v467_v6, %v337_v11  ;;  %v497_v15 = vpop.f32.mrb[3].mxu0 }
  0xf7   : > { %346 = vst.msk [vmem:[%s231_s6] sm:$0xff] %vm345_vm2, %v343_v13  ;;  %v344_v16 = vadd.f32 %v342_v12, %v338_v14 }
  0xf9   : > { %347 = vst.msk [vmem:[%s231_s6 + $0x8] sm:$0xff] %vm345_vm2, %v344_v16 }
  0xfa   : > { %575 = shalt.err (!%p572_p5)
}
  0xfb   : > { %s576_s22 = scalar_lea.hbm %s758_s13, 256  ;;  %s580_s5 = scalar_lea.hbm %s812_s4, 512 }
  0xfc   : > { %p577_p6 = scmp.ne.s32.totalorder %s758_s13, %s576_s22  ;;  %p581_p10 = scmp.lt.u32.totalorder %s758_s13, %s812_s4 }
  0xfd   : > { %p582_p11 = scmp.lt.u32.totalorder %s580_s5, %s576_s22  ;;  %p584_p13 = scmp.lt.u32.totalorder %s576_s22, %s758_s13 }
  0xfe   : > { %p578_p7 = pnand %p577_p6, %p712_p4 }
  0xff   : > { %p583_p12 = por %p582_p11, %p581_p10 }
 0x100   : > { %p579_p9 = pneg %p578_p7 }
 0x101   : > { %p585_p0 = por %p584_p13, %p583_p12 }
 0x103   : > { %p586_p1 = pnand %p585_p0, %p579_p9 }
 0x105   : > { %589 = shalt.err (!%p586_p1)
}
 0x106   : > { %s645_s9 = smov 128   ;;  %s646_s10 = smov 8  }
 0x107   : > { %498 = dma.vmem_to_hbm [thread:$0]  (%p712_p4), %s760_s7, 256, %s758_s13, %s762_s18, %s645_s9, %s645_s9, %s646_s10  }
 0x108 PF: > { %p504_p2 = scmp.ge.s32.totalorder %s640_s20, 2  ;;  %s379_s11 = sand.u32 1, %s620_s15  }
 0x109   : > { %s380_s12 = scalar_lea.sflag [#allocation3], %s379_s11 }
 0x10a   : > { %p501_p3 = pnand %p504_p2, %p719_p8 }
 0x10c   : > { %615 = dma.done.wait (!%p501_p3), %s380_s12, 256  }
 0x10d   : > { %617 = vsyncadd (!%p501_p3), %s380_s12, 4294967040  ;;  %s17_s20 = sadd.s32 1, %s640_s20   ;;  %s815_s15 = smov %s624_s16 }
 0x10e   : > { %p14_p5 = scmp.ge.s32.totalorder %s17_s20, 4   ;;  %s816_s16 = smov %s628_s17 }
 0x10f   : > { %s817_s17 = smov %s725_s28  ;;  %s818_s18 = smov %s636_s19 }
 0x110   : > { %s819_s19 = smov %s821_s23  ;;  %16 = sbr.rel (!%p14_p5) target bundleno = 4 (0x4), region = 74 }
 0x117   :  { %385 = vsyncpa [#allocation3], 1 }
 0x118   :  { %387 = vsyncpa [#allocation3 + $0x1], 1 }

</bundles_post_ra>
